<compile_context>
chip_gen: v7x
topology: tpu7x:2x2x1
jax: 0.10.0
libtpu: 0.0.40
codegen_flags: <defaults>
</compile_context>

<pallas_src>
import jax
import jax.numpy as jnp
from jax.experimental import pallas as pl
from jax.experimental.pallas import tpu as pltpu


HIDDEN = 256
LANE = 128           # TPU lane width; feature dims are padded to a multiple of this
SUBLANE_PACK = 16    # bf16 rows per packed sublane group
MAX_BLOCK_B = 1024   # per-tile row cap; fits v5e's 16 MiB scoped VMEM with headroom


def _round_up(n, m):
    return (n + m - 1) // m * m


def _cdiv(a, b):
    return -(-a // b)


def _choose_batch_tiling(B):
    """Pick (block_b, padded_batch) for the batch grid axis."""
    b_pad = _round_up(max(B, SUBLANE_PACK), SUBLANE_PACK)
    if b_pad <= 256:
        # Tiny batch: one grid step; splitting only adds per-step overhead.
        return b_pad, b_pad
    # >=2 tiles (v7x dual-TC sharding), ~512-row tiles for pipeline overlap,
    # capped at MAX_BLOCK_B rows (VMEM on v5e / v7x).
    n_tiles = max(2, min(8, _cdiv(b_pad, 512)))
    n_tiles = max(n_tiles, _cdiv(b_pad, MAX_BLOCK_B))
    block_b = min(MAX_BLOCK_B, _round_up(_cdiv(b_pad, n_tiles), SUBLANE_PACK))
    b_full = _round_up(b_pad, block_b)  # padding waste < block_b <= 1024 rows
    return block_b, b_full


def mlp_kernel(x_ref, w1_ref, b1_ref, w2_ref, b2_ref, w3_ref, b3_ref, o_ref):
    # Three MXU matmuls with bf16 operands / f32 accumulation, tanh in f32 on
    # the EUP, all fused in VMEM.
    h = jnp.dot(x_ref[...], w1_ref[...], preferred_element_type=jnp.float32)
    h = jnp.tanh(h + b1_ref[...]).astype(jnp.bfloat16)
    h = jnp.dot(h, w2_ref[...], preferred_element_type=jnp.float32)
    h = jnp.tanh(h + b2_ref[...]).astype(jnp.bfloat16)
    out = jnp.dot(h, w3_ref[...], preferred_element_type=jnp.float32) + b3_ref[...]
    o_ref[...] = out.astype(o_ref.dtype)


def mlp_forward(x, params):
    """x: (B, input_dim) float32. params: dict of f32 weights/biases."""
    B, input_dim = x.shape
    out_size = params["w3"].shape[1]

    # ---- lane-dense padding of narrow feature dims (zero-pad => no-op math) ----
    in_p = _round_up(input_dim, LANE)
    out_p = _round_up(out_size, LANE)
    block_b, b_full = _choose_batch_tiling(B)

    # Single fused pass over x: cast to bf16 and zero-pad rows + lanes.
    x_p = jnp.pad(x.astype(jnp.bfloat16),
                  ((0, b_full - B), (0, in_p - input_dim)))

    w1 = jnp.pad(params["w1"], ((0, in_p - input_dim), (0, 0))).astype(jnp.bfloat16)
    w2 = params["w2"].astype(jnp.bfloat16)
    w3 = jnp.pad(params["w3"], ((0, 0), (0, out_p - out_size))).astype(jnp.bfloat16)
    b1 = params["b1"].reshape(1, -1).astype(jnp.float32)
    b2 = params["b2"].reshape(1, -1).astype(jnp.float32)
    b3 = jnp.pad(params["b3"], (0, out_p - out_size)).reshape(1, -1).astype(jnp.float32)

    grid = (b_full // block_b,)

    flops = 2 * b_full * (in_p * HIDDEN + HIDDEN * HIDDEN + HIDDEN * out_p)
    transcendentals = 2 * b_full * HIDDEN  # two tanh layers
    bytes_accessed = (
        x_p.size * 2 + w1.size * 2 + w2.size * 2 + w3.size * 2
        + (b1.size + b2.size + b3.size) * 4
        + b_full * out_p * 4
    )

    # ---- explicit VMEM budget (double-buffered x/out tiles, single-buffered
    #      resident weights, intermediates), 2x headroom, clamped 16..64 MiB ----
    footprint = (
        2 * block_b * in_p * 2                                    # x tile (bf16) x2
        + 2 * block_b * out_p * 4                                 # out tile (f32) x2
        + (in_p * HIDDEN + HIDDEN * HIDDEN + HIDDEN * out_p) * 2  # weights, Buffered(1)
        + (2 * HIDDEN + out_p) * 4                                # biases
        + block_b * HIDDEN * (2 * 4 + 2 * 2)                      # f32 + bf16 hidden acts
        + block_b * out_p * 4                                     # f32 pre-store result
    )
    vmem_limit = int(min(64 << 20, max(16 << 20, 2 * footprint)))

    resident = dict(pipeline_mode=pl.Buffered(1))  # constant-index blocks: no double-buffer

    out = pl.pallas_call(
        mlp_kernel,
        out_shape=jax.ShapeDtypeStruct((b_full, out_p), jnp.float32),
        grid_spec=pltpu.PrefetchScalarGridSpec(
            num_scalar_prefetch=0,
            grid=grid,
            in_specs=[
                pl.BlockSpec((block_b, in_p), lambda i: (i, 0)),              # x tile
                pl.BlockSpec((in_p, HIDDEN), lambda i: (0, 0), **resident),   # w1
                pl.BlockSpec((1, HIDDEN), lambda i: (0, 0), **resident),      # b1
                pl.BlockSpec((HIDDEN, HIDDEN), lambda i: (0, 0), **resident), # w2
                pl.BlockSpec((1, HIDDEN), lambda i: (0, 0), **resident),      # b2
                pl.BlockSpec((HIDDEN, out_p), lambda i: (0, 0), **resident),  # w3
                pl.BlockSpec((1, out_p), lambda i: (0, 0), **resident),       # b3
            ],
            out_specs=pl.BlockSpec((block_b, out_p), lambda i: (i, 0)),
        ),
        compiler_params=pltpu.CompilerParams(
            dimension_semantics=("parallel",),
            vmem_limit_bytes=vmem_limit,
        ),
        cost_estimate=pl.CostEstimate(
            flops=flops,
            transcendentals=transcendentals,
            bytes_accessed=bytes_accessed,
        ),
    )(x_p, w1, b1, w2, b2, w3, b3)

    # strip batch / lane padding (padding rows hold tanh(bias) junk -> must slice)
    return out[:B, :out_size]


def init_params(key, input_dim, out_size):
    """Deterministic init matching PyTorch Linear's U(-1/sqrt(fan_in), +...)."""
    ks = jax.random.split(key, 6)

    def lin(kw, kb, fan_in, fan_out):
        bound = 1.0 / jnp.sqrt(fan_in)
        w = jax.random.uniform(kw, (fan_in, fan_out), jnp.float32, -bound, bound)
        b = jax.random.uniform(kb, (fan_out,), jnp.float32, -bound, bound)
        return w, b

    w1, b1 = lin(ks[0], ks[1], input_dim, HIDDEN)
    w2, b2 = lin(ks[2], ks[3], HIDDEN, HIDDEN)
    w3, b3 = lin(ks[4], ks[5], HIDDEN, out_size)
    return {"w1": w1, "b1": b1, "w2": w2, "b2": b2, "w3": w3, "b3": b3}


def mlp_reference_f32(x, p):
    h = jnp.tanh(x @ p["w1"] + p["b1"])
    h = jnp.tanh(h @ p["w2"] + p["b2"])
    return h @ p["w3"] + p["b3"]


def mlp_reference_bf16(x, p):
    # Mirrors the kernel's numerics: bf16 operands, f32 accumulation / bias / tanh.
    bf = jnp.bfloat16
    h = jnp.dot(x.astype(bf), p["w1"].astype(bf), preferred_element_type=jnp.float32)
    h = jnp.tanh(h + p["b1"])
    h = jnp.dot(h.astype(bf), p["w2"].astype(bf), preferred_element_type=jnp.float32)
    h = jnp.tanh(h + p["b2"])
    out = jnp.dot(h.astype(bf), p["w3"].astype(bf), preferred_element_type=jnp.float32)
    return out + p["b3"]


def _check(B, input_dim, out_size, key):
    k_x, k_p = jax.random.split(key)
    x = jax.random.normal(k_x, (B, input_dim), jnp.float32)
    params = init_params(k_p, input_dim, out_size)

    out = jax.block_until_ready(mlp_forward(x, params))
    assert out.shape == (B, out_size), out.shape

    ref_bf16 = mlp_reference_bf16(x, params)   # same numerics as kernel
    ref_f32 = mlp_reference_f32(x, params)     # full-precision reference
    assert jnp.allclose(out, ref_bf16, atol=1e-2, rtol=1e-2), (
        float(jnp.max(jnp.abs(out - ref_bf16)))
    )
    assert jnp.allclose(out, ref_f32, atol=5e-2, rtol=5e-2), (
        float(jnp.max(jnp.abs(out - ref_f32)))
    )


if __name__ == "__main__":
    key = jax.random.PRNGKey(0)
    k1, k2 = jax.random.split(key)

    # Small shape (single grid step path).
    _check(B=16, input_dim=32, out_size=16, key=k1)
    # Odd, larger batch (multi-tile path: exercises batch padding + grid > 1).
    _check(B=600, input_dim=32, out_size=16, key=k2)

    print("KERNEL_OK")
</pallas_src>

<mosaic_0001>
module attributes {stable_mosaic.version = 11 : i64} {
  func.func @mlp_kernel(%arg0: i32, %arg1: memref<16x128xbf16, #tpu.memory_space<vmem>>, %arg2: memref<128x256xbf16, #tpu.memory_space<vmem>>, %arg3: memref<1x256xf32, #tpu.memory_space<vmem>>, %arg4: memref<256x256xbf16, #tpu.memory_space<vmem>>, %arg5: memref<1x256xf32, #tpu.memory_space<vmem>>, %arg6: memref<256x128xbf16, #tpu.memory_space<vmem>>, %arg7: memref<1x128xf32, #tpu.memory_space<vmem>>, %arg8: memref<16x128xf32, #tpu.memory_space<vmem>>) attributes {dimension_semantics = [#tpu.dimension_semantics<parallel>], iteration_bounds = array<i64: 1>, scalar_prefetch = 0 : i64, scratch_operands = 0 : i64, tpu.core_type = #tpu.core_type<tc>, window_params = [{transform_indices = @transform_0, window_bounds = array<i64: 16, 128>}, {pipeline_mode = #tpu.pipeline_mode<synchronous>, transform_indices = @transform_1, window_bounds = array<i64: 128, 256>}, {pipeline_mode = #tpu.pipeline_mode<synchronous>, transform_indices = @transform_2, window_bounds = array<i64: 1, 256>}, {pipeline_mode = #tpu.pipeline_mode<synchronous>, transform_indices = @transform_3, window_bounds = array<i64: 256, 256>}, {pipeline_mode = #tpu.pipeline_mode<synchronous>, transform_indices = @transform_4, window_bounds = array<i64: 1, 256>}, {pipeline_mode = #tpu.pipeline_mode<synchronous>, transform_indices = @transform_5, window_bounds = array<i64: 256, 128>}, {pipeline_mode = #tpu.pipeline_mode<synchronous>, transform_indices = @transform_6, window_bounds = array<i64: 1, 128>}, {transform_indices = @transform_7, window_bounds = array<i64: 16, 128>}]} {
    %c0 = arith.constant 0 : index
    %c0_0 = arith.constant 0 : index
    %0 = vector.load %arg1[%c0, %c0_0] : memref<16x128xbf16, #tpu.memory_space<vmem>>, vector<16x128xbf16>
    %c0_1 = arith.constant 0 : index
    %c0_2 = arith.constant 0 : index
    %1 = vector.load %arg2[%c0_1, %c0_2] : memref<128x256xbf16, #tpu.memory_space<vmem>>, vector<128x256xbf16>
    %cst = arith.constant dense<0.000000e+00> : vector<16x256xf32>
    %2 = tpu.matmul %0, %1, %cst {dimension_numbers = #tpu.dot_dimension_numbers<[1], [0], [0], [1], [0, 0, 1, 1], [], []>} : vector<16x128xbf16>, vector<128x256xbf16>, vector<16x256xf32> -> vector<16x256xf32>
    %c0_3 = arith.constant 0 : index
    %c0_4 = arith.constant 0 : index
    %3 = vector.load %arg3[%c0_3, %c0_4] : memref<1x256xf32, #tpu.memory_space<vmem>>, vector<1x256xf32>
    %4 = vector.broadcast %3 : vector<1x256xf32> to vector<16x256xf32>
    %5 = arith.addf %2, %4 : vector<16x256xf32>
    %6 = math.tanh %5 : vector<16x256xf32>
    %7 = arith.truncf %6 : vector<16x256xf32> to vector<16x256xbf16>
    %c0_5 = arith.constant 0 : index
    %c0_6 = arith.constant 0 : index
    %8 = vector.load %arg4[%c0_5, %c0_6] : memref<256x256xbf16, #tpu.memory_space<vmem>>, vector<256x256xbf16>
    %cst_7 = arith.constant dense<0.000000e+00> : vector<16x256xf32>
    %9 = tpu.matmul %7, %8, %cst_7 {dimension_numbers = #tpu.dot_dimension_numbers<[1], [0], [0], [1], [0, 0, 1, 1], [], []>} : vector<16x256xbf16>, vector<256x256xbf16>, vector<16x256xf32> -> vector<16x256xf32>
    %c0_8 = arith.constant 0 : index
    %c0_9 = arith.constant 0 : index
    %10 = vector.load %arg5[%c0_8, %c0_9] : memref<1x256xf32, #tpu.memory_space<vmem>>, vector<1x256xf32>
    %11 = vector.broadcast %10 : vector<1x256xf32> to vector<16x256xf32>
    %12 = arith.addf %9, %11 : vector<16x256xf32>
    %13 = math.tanh %12 : vector<16x256xf32>
    %14 = arith.truncf %13 : vector<16x256xf32> to vector<16x256xbf16>
    %c0_10 = arith.constant 0 : index
    %c0_11 = arith.constant 0 : index
    %15 = vector.load %arg6[%c0_10, %c0_11] : memref<256x128xbf16, #tpu.memory_space<vmem>>, vector<256x128xbf16>
    %cst_12 = arith.constant dense<0.000000e+00> : vector<16x128xf32>
    %16 = tpu.matmul %14, %15, %cst_12 {dimension_numbers = #tpu.dot_dimension_numbers<[1], [0], [0], [1], [0, 0, 1, 1], [], []>} : vector<16x256xbf16>, vector<256x128xbf16>, vector<16x128xf32> -> vector<16x128xf32>
    %c0_13 = arith.constant 0 : index
    %c0_14 = arith.constant 0 : index
    %17 = vector.load %arg7[%c0_13, %c0_14] : memref<1x128xf32, #tpu.memory_space<vmem>>, vector<1x128xf32>
    %18 = vector.broadcast %17 : vector<1x128xf32> to vector<16x128xf32>
    %19 = arith.addf %16, %18 : vector<16x128xf32>
    %c0_15 = arith.constant 0 : index
    %c0_16 = arith.constant 0 : index
    %20 = vector.load %arg8[%c0_15, %c0_16] : memref<16x128xf32, #tpu.memory_space<vmem>>, vector<16x128xf32>
    tpu.vector_store %arg8[%c0_15, %c0_16], %19 {strides = array<i32>} : memref<16x128xf32, #tpu.memory_space<vmem>>, vector<16x128xf32>,
    return
  }
  func.func @transform_0(%arg0: i32) -> (i32, i32) {
    %c0_i32 = arith.constant 0 : i32
    %c0_i32_0 = arith.constant 0 : i32
    return %arg0, %c0_i32 : i32, i32
  }
  func.func @transform_1(%arg0: i32) -> (i32, i32) {
    %c0_i32 = arith.constant 0 : i32
    %c0_i32_0 = arith.constant 0 : i32
    %c0_i32_1 = arith.constant 0 : i32
    return %c0_i32, %c0_i32_0 : i32, i32
  }
  func.func @transform_2(%arg0: i32) -> (i32, i32) {
    %c0_i32 = arith.constant 0 : i32
    %c0_i32_0 = arith.constant 0 : i32
    %c0_i32_1 = arith.constant 0 : i32
    return %c0_i32, %c0_i32_0 : i32, i32
  }
  func.func @transform_3(%arg0: i32) -> (i32, i32) {
    %c0_i32 = arith.constant 0 : i32
    %c0_i32_0 = arith.constant 0 : i32
    %c0_i32_1 = arith.constant 0 : i32
    return %c0_i32, %c0_i32_0 : i32, i32
  }
  func.func @transform_4(%arg0: i32) -> (i32, i32) {
    %c0_i32 = arith.constant 0 : i32
    %c0_i32_0 = arith.constant 0 : i32
    %c0_i32_1 = arith.constant 0 : i32
    return %c0_i32, %c0_i32_0 : i32, i32
  }
  func.func @transform_5(%arg0: i32) -> (i32, i32) {
    %c0_i32 = arith.constant 0 : i32
    %c0_i32_0 = arith.constant 0 : i32
    %c0_i32_1 = arith.constant 0 : i32
    return %c0_i32, %c0_i32_0 : i32, i32
  }
  func.func @transform_6(%arg0: i32) -> (i32, i32) {
    %c0_i32 = arith.constant 0 : i32
    %c0_i32_0 = arith.constant 0 : i32
    %c0_i32_1 = arith.constant 0 : i32
    return %c0_i32, %c0_i32_0 : i32, i32
  }
  func.func @transform_7(%arg0: i32) -> (i32, i32) {
    %c0_i32 = arith.constant 0 : i32
    %c0_i32_0 = arith.constant 0 : i32
    return %arg0, %c0_i32 : i32, i32
  }
}

</mosaic_0001>

<bundles_post_ra>
// kernel: tpu_custom_call.1
= control target key start
LH: loop header
LB: loop body
LE: loop exit
PB: predicated region body
PF: predicated region fallthrough
CT: control target
= control target key end

     0   :  { %12 = vsyncpa [#allocation3], 0  ;;  %s1160_s0 = inlined_call_operand.hbm [shape: bf16[16,128], index: 0, kind: input, shape index: {}]   ;;  %s1161_s1 = inlined_call_operand.hbm [shape: bf16[128,256], index: 1, kind: input, shape index: {}]   ;;  %s1162_s2 = inlined_call_operand.vmem [shape: f32[1,256], index: 2, kind: input, shape index: {}]   ;;  %s1163_s3 = inlined_call_operand.hbm [shape: bf16[256,256], index: 3, kind: input, shape index: {}]   ;;  %s1164_s4 = inlined_call_operand.vmem [shape: f32[1,256], index: 4, kind: input, shape index: {}]   ;;  %s1165_s5 = inlined_call_operand.hbm [shape: bf16[256,128], index: 5, kind: input, shape index: {}]   ;;  %s1166_s6 = inlined_call_operand.vmem [shape: f32[1,128], index: 6, kind: input, shape index: {}]   ;;  %s1167_s7 = inlined_call_operand.hbm [shape: f32[16,128], index: 7, kind: output, shape index: {}]  }
   0x1   :  { %13 = vsyncpa [#allocation6], 0 }
   0x2   :  { %14 = vsyncpa [#allocation9], 0 }
   0x3   :  { %15 = vsyncpa [#allocation4], 0  ;;  %s1019_s24 = smov [#allocation5]   ;;  %s901_s28 = scalar_lea.hbm %s1161_s1, 2048 }
   0x4   :  { %s33_s25 = sshll.u32 %s1019_s24, 4  ;;  %p902_p0 = scmp.ne.s32.totalorder %s1161_s1, %s901_s28  ;;  %s34_s25 = int_to_ptr.vmem [resolvable:$true] %s33_s25 }
   0x5   :  { %p905_p1 = scmp.lt.u32.totalorder %s901_s28, %s1161_s1 }
   0x7   :  { %p907_p2 = pnand %p905_p1, %p902_p0 }
   0x9   :  { %910 = shalt.err (!%p907_p2)
}
   0xa   :  { %s911_s10 = scalar_lea.vmem %s34_s25, 2048  ;;  %p916_p4 = scmp.lt.s32.totalorder %s34_s25, %s34_s25 }
   0xb   :  { %p912_p3 = scmp.ne.s32.totalorder %s34_s25, %s911_s10  ;;  %p917_p5 = scmp.lt.s32.totalorder %s911_s10, %s911_s10 }
   0xd   :  { %p918_p6 = por %p917_p5, %p916_p4 }
   0xf   :  { %p919_p7 = pnand %p918_p6, %p912_p3 }
  0x11   :  { %922 = shalt.err (!%p919_p7)
}
  0x12   :  { %s1020_s11 = smov 128   ;;  %s1021_s12 = smov 8  }
  0x13   :  { %39 = dma.hbm_to_vmem [thread:$0]  %s1161_s1, 2048, %s34_s25, [#allocation6], %s1020_s11, %s1020_s11, %s1021_s12  }
  0x14   :  { %s1022_s15 = smov [#allocation2]   ;;  %s923_s19 = scalar_lea.hbm %s1160_s0, 128 }
  0x15   :  { %s21_s16 = sshll.u32 %s1022_s15, 4  ;;  %p924_p8 = scmp.ne.s32.totalorder %s1160_s0, %s923_s19  ;;  %s22_s16 = int_to_ptr.vmem [resolvable:$true] %s21_s16 }
  0x16   :  { %p927_p9 = scmp.lt.u32.totalorder %s923_s19, %s1160_s0 }
  0x18   :  { %p929_p10 = pnand %p927_p9, %p924_p8 }
  0x1a   :  { %932 = shalt.err (!%p929_p10)
}
  0x1b   :  { %s933_s24 = scalar_lea.vmem %s22_s16, 128  ;;  %p938_p12 = scmp.lt.s32.totalorder %s22_s16, %s22_s16 }
  0x1c   :  { %p934_p11 = scmp.ne.s32.totalorder %s22_s16, %s933_s24  ;;  %p939_p13 = scmp.lt.s32.totalorder %s933_s24, %s933_s24 }
  0x1e   :  { %p940_p0 = por %p939_p13, %p938_p12 }
  0x20   :  { %p941_p1 = pnand %p940_p0, %p934_p11 }
  0x22   :  { %944 = shalt.err (!%p941_p1)
}
  0x23   :  { %s1023_s1 = smov 64   ;;  %s1024_s25 = smov 4  }
  0x24   :  { %27 = dma.hbm_to_vmem [thread:$0]  %s1160_s0, 128, %s22_s16, [#allocation3], %s1023_s1, %s1023_s1, %s1024_s25  }
  0x25   :  { %s1025_s28 = smov [#allocation7]   ;;  %s1026_s30 = smov [#allocation8]  }
  0x26   :  { %s47_s29 = sshll.u32 %s1025_s28, 4  ;;  %s61_s8 = sshll.u32 %s1026_s30, 4  ;;  %s48_s29 = int_to_ptr.vmem [resolvable:$true] %s47_s29  ;;  %s1099_s8 = int_to_ptr.vmem [resolvable:$true] %s61_s8 }
  0x27   :  { %s945_s13 = scalar_lea.hbm %s1163_s3, 4096 }
  0x28   :  { %p946_p2 = scmp.ne.s32.totalorder %s1163_s3, %s945_s13  ;;  %p949_p3 = scmp.lt.u32.totalorder %s945_s13, %s1163_s3 }
  0x2a   :  { %p951_p4 = pnand %p949_p3, %p946_p2 }
  0x2c   :  { %954 = shalt.err (!%p951_p4)
}
  0x2d   :  { %s955_s0 = scalar_lea.vmem %s48_s29, 4096  ;;  %p960_p6 = scmp.lt.s32.totalorder %s48_s29, %s48_s29 }
  0x2e   :  { %p956_p5 = scmp.ne.s32.totalorder %s48_s29, %s955_s0  ;;  %p961_p7 = scmp.lt.s32.totalorder %s955_s0, %s955_s0 }
  0x30   :  { %p962_p8 = por %p961_p7, %p960_p6 }
  0x32   :  { %p963_p9 = pnand %p962_p8, %p956_p5 }
  0x34   :  { %966 = shalt.err (!%p963_p9)
}
  0x35   :  { %53 = dma.hbm_to_vmem [thread:$0]  %s1163_s3, 4096, %s48_s29, [#allocation6], %s1020_s11, %s1020_s11, %s1021_s12  }
  0x36   :  { %s967_s22 = scalar_lea.hbm %s1165_s5, 2048 }
  0x37   :  { %p968_p10 = scmp.ne.s32.totalorder %s1165_s5, %s967_s22  ;;  %p971_p11 = scmp.lt.u32.totalorder %s967_s22, %s1165_s5 }
  0x39   :  { %p973_p12 = pnand %p971_p11, %p968_p10 }
  0x3b   :  { %976 = shalt.err (!%p973_p12)
}
  0x3c   :  { %s977_s28 = scalar_lea.vmem %s1099_s8, 2048  ;;  %p982_p0 = scmp.lt.s32.totalorder %s1099_s8, %s1099_s8 }
  0x3d   :  { %p978_p13 = scmp.ne.s32.totalorder %s1099_s8, %s977_s28  ;;  %p983_p1 = scmp.lt.s32.totalorder %s977_s28, %s977_s28 }
  0x3f   :  { %p984_p2 = por %p983_p1, %p982_p0 }
  0x41   :  { %p985_p3 = pnand %p984_p2, %p978_p13 }
  0x43   :  { %988 = shalt.err (!%p985_p3)
}
  0x44   :  { %67 = dma.hbm_to_vmem [thread:$0]  %s1165_s5, 2048, %s1099_s8, [#allocation9], %s1023_s1, %s1023_s1, %s1024_s25  }
  0x45   :  { %1011 = dma.done.wait [#allocation3], 128  }
  0x46   :  { %1012 = vsyncadd [#allocation3], 4294967168 }
  0x47   :  { %1013 = dma.done.wait [#allocation6], 6144  }
  0x48   :  { %1014 = vsyncadd [#allocation6], 4294961152 }
  0x49   :  { %1015 = dma.done.wait [#allocation9], 2048  }
  0x4a   :  { %1016 = vsyncadd [#allocation9], 4294965248  ;;  %v1027_v0 = vmov 0   ;;  %v796_v1 = vld [vmem:[#allocation5 + $0x4] ss:$8 sps:$4 sm:$0xff]   ;;  %v820_v28 = vld [vmem:[#allocation2] sm:$0xff]   ;;  %v103_v56 = vlaneseq }
  0x4b   :  { %231 = vmatprep.mubr.bf16.mxu0 %v1027_v0  ;;  %v798_v2 = vld [vmem:[#allocation5] ss:$8 sps:$4 sm:$0xff]   ;;  %199 = vmatprep.subr.bf16.mxu0 %v796_v1  ;;  %v799_v3 = vld [vmem:[#allocation5 + $0x14] ss:$8 sps:$4 sm:$0xff]   ;;  %v801_v4 = vld [vmem:[#allocation5 + $0x10] ss:$8 sps:$4 sm:$0xff]  }
  0x4c   :  { %200 = vmatpush1.bf16.msra.mxu0 %v798_v2  ;;  %v802_v5 = vld [vmem:[#allocation5 + $0x24] ss:$8 sps:$4 sm:$0xff]   ;;  %v804_v6 = vld [vmem:[#allocation5 + $0x20] ss:$8 sps:$4 sm:$0xff]   ;;  %v805_v7 = vld [vmem:[#allocation5 + $0x34] ss:$8 sps:$4 sm:$0xff]  }
  0x4d   :  { %201 = vmatprep.subr.bf16.mxu0 %v799_v3  ;;  %v807_v8 = vld [vmem:[#allocation5 + $0x30] ss:$8 sps:$4 sm:$0xff]   ;;  %v808_v9 = vld [vmem:[#allocation5 + $0x44] ss:$8 sps:$4 sm:$0xff]   ;;  %v823_v11 = vld [vmem:[#allocation7] ss:$8 sps:$4 sm:$0xff]  }
  0x4e   :  { %v821_v10 = vld [vmem:[#allocation7 + $0x4] ss:$8 sps:$4 sm:$0xff]   ;;  %v824_v12 = vld [vmem:[#allocation7 + $0x14] ss:$8 sps:$4 sm:$0xff]   ;;  %v810_v13 = vld [vmem:[#allocation5 + $0x40] ss:$8 sps:$4 sm:$0xff]  }
  0x4f   :  { %452 = vmatprep.subr.bf16.mxu1 %v821_v10  ;;  %v826_v14 = vld [vmem:[#allocation7 + $0x10] ss:$8 sps:$4 sm:$0xff]   ;;  %v811_v15 = vld [vmem:[#allocation5 + $0x54] ss:$8 sps:$4 sm:$0xff]   ;;  %v827_v16 = vld [vmem:[#allocation7 + $0x24] ss:$8 sps:$4 sm:$0xff]  }
  0x50   :  { %202 = vmatpush1.bf16.msra.mxu0 %v801_v4  ;;  %453 = vmatpush1.bf16.msra.mxu1 %v823_v11  ;;  %v813_v17 = vld [vmem:[#allocation5 + $0x50] ss:$8 sps:$4 sm:$0xff]   ;;  %v829_v18 = vld [vmem:[#allocation7 + $0x20] ss:$8 sps:$4 sm:$0xff]   ;;  %v814_v19 = vld [vmem:[#allocation5 + $0x64] ss:$8 sps:$4 sm:$0xff]  }
  0x51   :  { %203 = vmatprep.subr.bf16.mxu0 %v802_v5  ;;  %454 = vmatprep.subr.bf16.mxu1 %v824_v12  ;;  %v830_v20 = vld [vmem:[#allocation7 + $0x34] ss:$8 sps:$4 sm:$0xff]   ;;  %v816_v21 = vld [vmem:[#allocation5 + $0x60] ss:$8 sps:$4 sm:$0xff]   ;;  %v832_v22 = vld [vmem:[#allocation7 + $0x30] ss:$8 sps:$4 sm:$0xff]  }
  0x52   :  { %v817_v23 = vld [vmem:[#allocation5 + $0x74] ss:$8 sps:$4 sm:$0xff]   ;;  %v833_v24 = vld [vmem:[#allocation7 + $0x44] ss:$8 sps:$4 sm:$0xff]   ;;  %v819_v25 = vld [vmem:[#allocation5 + $0x70] ss:$8 sps:$4 sm:$0xff]  }
  0x53   :  { %v835_v26 = vld [vmem:[#allocation7 + $0x40] ss:$8 sps:$4 sm:$0xff]   ;;  %v836_v27 = vld [vmem:[#allocation7 + $0x54] ss:$8 sps:$4 sm:$0xff]   ;;  %v838_v29 = vld [vmem:[#allocation7 + $0x50] ss:$8 sps:$4 sm:$0xff]  }
  0x54   :  { %204 = vmatpush1.bf16.msra.mxu0 %v804_v6  ;;  %455 = vmatpush1.bf16.msra.mxu1 %v826_v14  ;;  %v839_v30 = vld [vmem:[#allocation7 + $0x64] ss:$8 sps:$4 sm:$0xff]   ;;  %v841_v31 = vld [vmem:[#allocation7 + $0x60] ss:$8 sps:$4 sm:$0xff]   ;;  %v842_v32 = vld [vmem:[#allocation7 + $0x74] ss:$8 sps:$4 sm:$0xff]  }
  0x55   :  { %205 = vmatprep.subr.bf16.mxu0 %v805_v7  ;;  %456 = vmatprep.subr.bf16.mxu1 %v827_v16  ;;  %v844_v33 = vld [vmem:[#allocation7 + $0x70] ss:$8 sps:$4 sm:$0xff]   ;;  %v845_v34 = vld [vmem:[#allocation7 + $0x84] ss:$8 sps:$4 sm:$0xff]   ;;  %v847_v35 = vld [vmem:[#allocation7 + $0x80] ss:$8 sps:$4 sm:$0xff]  }
  0x56   :  { %v848_v36 = vld [vmem:[#allocation7 + $0x94] ss:$8 sps:$4 sm:$0xff]   ;;  %v850_v37 = vld [vmem:[#allocation7 + $0x90] ss:$8 sps:$4 sm:$0xff]   ;;  %v851_v38 = vld [vmem:[#allocation7 + $0xa4] ss:$8 sps:$4 sm:$0xff]  }
  0x57   :  { %v853_v39 = vld [vmem:[#allocation7 + $0xa0] ss:$8 sps:$4 sm:$0xff]   ;;  %v854_v40 = vld [vmem:[#allocation7 + $0xb4] ss:$8 sps:$4 sm:$0xff]   ;;  %v856_v41 = vld [vmem:[#allocation7 + $0xb0] ss:$8 sps:$4 sm:$0xff]  }
  0x58   :  { %206 = vmatpush1.bf16.msra.mxu0 %v807_v8  ;;  %457 = vmatpush1.bf16.msra.mxu1 %v829_v18  ;;  %v857_v42 = vld [vmem:[#allocation7 + $0xc4] ss:$8 sps:$4 sm:$0xff]   ;;  %v859_v43 = vld [vmem:[#allocation7 + $0xc0] ss:$8 sps:$4 sm:$0xff]   ;;  %v860_v44 = vld [vmem:[#allocation7 + $0xd4] ss:$8 sps:$4 sm:$0xff]  }
  0x59   :  { %207 = vmatprep.subr.bf16.mxu0 %v808_v9  ;;  %458 = vmatprep.subr.bf16.mxu1 %v830_v20  ;;  %v862_v45 = vld [vmem:[#allocation7 + $0xd0] ss:$8 sps:$4 sm:$0xff]   ;;  %v863_v46 = vld [vmem:[#allocation7 + $0xe4] ss:$8 sps:$4 sm:$0xff]   ;;  %v865_v47 = vld [vmem:[#allocation7 + $0xe0] ss:$8 sps:$4 sm:$0xff]  }
  0x5a   :  { %v866_v48 = vld [vmem:[#allocation7 + $0xf4] ss:$8 sps:$4 sm:$0xff]   ;;  %v868_v49 = vld [vmem:[#allocation7 + $0xf0] ss:$8 sps:$4 sm:$0xff]   ;;  %v869_v50 = vld [vmem:[#allocation8 + $0x40] sm:$0xff]   ;;  %v104_v57 = vshrl.u32 %v103_v56, 7 }
  0x5b   :  { %v870_v51 = vld [vmem:[#allocation8] sm:$0xff]   ;;  %v871_v52 = vld [vmem:[#allocation8 + $0x48] sm:$0xff]   ;;  %v873_v54 = vld [vmem:[#allocation8 + $0x50] sm:$0xff]   ;;  %s1028_s8 = smov [#allocation10]  }
  0x5c   :  { %208 = vmatpush1.bf16.msra.mxu0 %v810_v13  ;;  %459 = vmatpush1.bf16.msra.mxu1 %v832_v22  ;;  %v872_v53 = vld [vmem:[#allocation8 + $0x8] sm:$0xff]   ;;  %v874_v55 = vld [vmem:[#allocation8 + $0x10] sm:$0xff]   ;;  %v105_v58 = vsub.s32 0, %v104_v57  ;;  %v101_v59 = vld [vmem:[%s1162_s2] sm:$0x3]  ;;  %v109_v60 = vsub.s32 1, %v104_v57 }
  0x5d   :  { %209 = vmatprep.subr.bf16.mxu0 %v811_v15  ;;  %460 = vmatprep.subr.bf16.mxu1 %v833_v24  ;;  %v875_v13 = vld [vmem:[#allocation8 + $0x58] sm:$0xff]   ;;  %v877_v15 = vld [vmem:[#allocation8 + $0x60] sm:$0xff]   ;;  %v880_v18 = vld [vmem:[#allocation8 + $0x28] sm:$0xff]   ;;  %s684_s9 = sshll.u32 %s1028_s8, 4  ;;  %s685_s9 = int_to_ptr.vmem [resolvable:$true] %s684_s9 }
  0x5e   :  { %v106_v61 = vrot.slane %v101_v59, %v105_v58  ;;  %v110_v62 = vrot.slane %v101_v59, %v109_v60  ;;  %v876_v14 = vld [vmem:[#allocation8 + $0x18] sm:$0xff]   ;;  %v878_v16 = vld [vmem:[#allocation8 + $0x20] sm:$0xff]   ;;  %v882_v20 = vld [vmem:[#allocation8 + $0x30] sm:$0xff]   ;;  %s989_s10 = scalar_lea.vmem %s685_s9, 256  ;;  %p994_p5 = scmp.lt.s32.totalorder %s685_s9, %s685_s9 }
  0x5f   :  { %v884_v22 = vld [vmem:[#allocation8 + $0x38] sm:$0xff]   ;;  %p990_p4 = scmp.ne.s32.totalorder %s685_s9, %s989_s10  ;;  %p995_p6 = scmp.lt.s32.totalorder %s989_s10, %s989_s10 }
  0x60   :  { %210 = vmatpush1.bf16.msra.mxu0 %v813_v17  ;;  %461 = vmatpush1.bf16.msra.mxu1 %v835_v26  ;;  %v879_v17 = vld [vmem:[#allocation8 + $0x68] sm:$0xff]  }
  0x61   :  { %211 = vmatprep.subr.bf16.mxu0 %v814_v19  ;;  %462 = vmatprep.subr.bf16.mxu1 %v836_v27  ;;  %v881_v19 = vld [vmem:[#allocation8 + $0x70] sm:$0xff]   ;;  %p996_p7 = por %p995_p6, %p994_p5 }
  0x63   :  { %p997_p8 = pnand %p996_p7, %p990_p4 }
  0x64   :  { %212 = vmatpush1.bf16.msra.mxu0 %v816_v21  ;;  %463 = vmatpush1.bf16.msra.mxu1 %v838_v29  ;;  %v883_v21 = vld [vmem:[#allocation8 + $0x78] sm:$0xff]  }
  0x65   :  { %213 = vmatprep.subr.bf16.mxu0 %v817_v23  ;;  %464 = vmatprep.subr.bf16.mxu1 %v839_v30  ;;  %v280_v23 = vld [vmem:[%s1164_s4] sm:$0x3] }
  0x66   :  { %v285_v24 = vrot.slane %v280_v23, %v105_v58 }
  0x68   :  { %214 = vmatpush1.bf16.msra.mxu0 %v819_v25  ;;  %465 = vmatpush1.bf16.msra.mxu1 %v841_v31  ;;  %v289_v25 = vrot.slane %v280_v23, %v109_v60 }
  0x69   :  { %466 = vmatprep.subr.bf16.mxu1 %v842_v32  ;;  %764 = vmatprep.subr.bf16.mxu0 %v869_v50 }
  0x6b   :  { %232 = vmatmul.mubr.bf16.vlgmr.msra.gmra.mrb[0].mxu0 %v820_v28 }
  0x6c   :  { %467 = vmatpush1.bf16.msra.mxu1 %v844_v33  ;;  %765 = vmatpush3.bf16.msra.mxu0 %v870_v51 }
  0x6d   :  { %468 = vmatprep.subr.bf16.mxu1 %v845_v34  ;;  %766 = vmatprep.subr.bf16.mxu0 %v871_v52 }
  0x70   :  { %469 = vmatpush1.bf16.msra.mxu1 %v847_v35  ;;  %767 = vmatpush3.bf16.msra.mxu0 %v872_v53 }
  0x71   :  { %470 = vmatprep.subr.bf16.mxu1 %v848_v36  ;;  %768 = vmatprep.subr.bf16.mxu0 %v873_v54 }
  0x74   :  { %471 = vmatpush1.bf16.msra.mxu1 %v850_v37  ;;  %769 = vmatpush3.bf16.msra.mxu0 %v874_v55 }
  0x75   :  { %472 = vmatprep.subr.bf16.mxu1 %v851_v38  ;;  %770 = vmatprep.subr.bf16.mxu0 %v875_v13 }
  0x78   :  { %473 = vmatpush1.bf16.msra.mxu1 %v853_v39  ;;  %771 = vmatpush3.bf16.msra.mxu0 %v876_v14 }
  0x79   :  { %474 = vmatprep.subr.bf16.mxu1 %v854_v40  ;;  %772 = vmatprep.subr.bf16.mxu0 %v877_v15 }
  0x7c   :  { %475 = vmatpush1.bf16.msra.mxu1 %v856_v41  ;;  %773 = vmatpush3.bf16.msra.mxu0 %v878_v16  ;;  %v747_v41 = vld [vmem:[%s1166_s6] ss:$0 sm:$0xff] }
  0x7d   :  { %476 = vmatprep.subr.bf16.mxu1 %v857_v42  ;;  %774 = vmatprep.subr.bf16.mxu0 %v879_v17 }
  0x80   :  { %477 = vmatpush1.bf16.msra.mxu1 %v859_v43  ;;  %775 = vmatpush3.bf16.msra.mxu0 %v880_v18 }
  0x81   :  { %478 = vmatprep.subr.bf16.mxu1 %v860_v44  ;;  %776 = vmatprep.subr.bf16.mxu0 %v881_v19 }
  0x84   :  { %479 = vmatpush1.bf16.msra.mxu1 %v862_v45  ;;  %777 = vmatpush3.bf16.msra.mxu0 %v882_v20 }
  0x85   :  { %480 = vmatprep.subr.bf16.mxu1 %v863_v46  ;;  %778 = vmatprep.subr.bf16.mxu0 %v883_v21 }
  0x88   :  { %481 = vmatpush1.bf16.msra.mxu1 %v865_v47  ;;  %779 = vmatpush3.bf16.msra.mxu0 %v884_v22 }
  0x89   :  { %482 = vmatprep.subr.bf16.mxu1 %v866_v48 }
  0x8c   :  { %483 = vmatpush1.bf16.msra.mxu1 %v868_v49 }
 0x13e   :  { %v233_v63 = vpop.f32.mrb[0].mxu0 }
 0x13f   :  { %v234_v0 = vadd.f32 %v233_v63, %v106_v61  ;;  %v235_v1 = vpop.f32.mrb[1].mxu0 }
 0x140   :  { %v236_v2 = vadd.f32 %v235_v1, %v110_v62  ;;  %v237_v3 = vpop.f32.mrb[2].mxu0 }
 0x141   :  { %885 = vtanh.f32 %v234_v0  ;;  %v238_v4 = vadd.f32 %v237_v3, %v106_v61  ;;  %v239_v5 = vpop.f32.mrb[3].mxu0 }
 0x142   :  { %887 = vtanh.f32 %v236_v2  ;;  %v240_v6 = vadd.f32 %v239_v5, %v110_v62 }
 0x143   :  { %889 = vtanh.f32 %v238_v4 }
 0x144   :  { %891 = vtanh.f32 %v240_v6 }
 0x14b   :  { %v886_v7 = vpop.eup %885 }
 0x14c   :  { %v888_v8 = vpop.eup %887 }
 0x14d   :  { %v890_v9 = vpop.eup %889 }
 0x14e   :  { %v892_v10 = vpop.eup %891  ;;  %v246_v11 = vpack.c.bf16 %v890_v9, %v886_v7 }
 0x14f   :  { %v247_v12 = vpack.c.bf16 %v892_v10, %v888_v8 }
 0x151   :  { %484 = vmatprep.mubr.bf16.mxu1 %v247_v12 }
 0x152   :  { %485 = vmatmul.mubr.bf16.vlgmr.msra.gmra.mrb[0].mxu1 %v246_v11 }
 0x225   :  { %v486_v26 = vpop.f32.mrb[0].mxu1 }
 0x226   :  { %v487_v27 = vadd.f32 %v486_v26, %v285_v24  ;;  %v488_v28 = vpop.f32.mrb[1].mxu1 }
 0x227   :  { %v489_v29 = vadd.f32 %v488_v28, %v289_v25  ;;  %v490_v30 = vpop.f32.mrb[2].mxu1 }
 0x228   :  { %893 = vtanh.f32 %v487_v27  ;;  %v491_v31 = vadd.f32 %v490_v30, %v285_v24  ;;  %v492_v32 = vpop.f32.mrb[3].mxu1 }
 0x229   :  { %895 = vtanh.f32 %v489_v29  ;;  %v493_v33 = vadd.f32 %v492_v32, %v289_v25 }
 0x22a   :  { %897 = vtanh.f32 %v491_v31 }
 0x22b   :  { %899 = vtanh.f32 %v493_v33 }
 0x232   :  { %v894_v34 = vpop.eup %893 }
 0x233   :  { %v896_v35 = vpop.eup %895 }
 0x234   :  { %v898_v36 = vpop.eup %897 }
 0x235   :  { %v900_v37 = vpop.eup %899  ;;  %v499_v38 = vpack.c.bf16 %v898_v36, %v894_v34 }
 0x236   :  { %v500_v39 = vpack.c.bf16 %v900_v37, %v896_v35 }
 0x238   :  { %668 = vmatprep.mubr.bf16.mxu0 %v500_v39 }
 0x239   :  { %669 = vmatmul.mubr.bf16.vlgmr.msra.gmra.mrb[4].mxu0 %v499_v38 }
 0x30c   :  { %v780_v40 = vpop.f32.mrb[4].mxu0 }
 0x30d   :  { %v781_v42 = vpop.f32.mrb[5].mxu0 }
 0x30e   :  { %v782_v43 = vadd.f32 %v781_v42, %v780_v40  ;;  %v783_v44 = vpop.f32.mrb[6].mxu0 }
 0x30f   :  { %v784_v45 = vpop.f32.mrb[7].mxu0 }
 0x310   :  { %v671_v46 = vadd.f32 %v782_v43, %v747_v41  ;;  %v785_v47 = vadd.f32 %v784_v45, %v783_v44 }
 0x312   :  { %677 = vst [vmem:[#allocation10] sm:$0xff] %v671_v46  ;;  %v674_v48 = vadd.f32 %v785_v47, %v747_v41 }
 0x314   :  { %678 = vst [vmem:[#allocation10 + $0x8] sm:$0xff] %v674_v48 }
 0x315   :  { %1000 = shalt.err (!%p997_p8)
}
 0x316   :  { %s1001_s14 = scalar_lea.hbm %s1167_s7, 256 }
 0x317   :  { %p1002_p9 = scmp.ne.s32.totalorder %s1167_s7, %s1001_s14  ;;  %p1005_p10 = scmp.lt.u32.totalorder %s1001_s14, %s1167_s7 }
 0x319   :  { %p1007_p11 = pnand %p1005_p10, %p1002_p9 }
 0x31b   :  { %1010 = shalt.err (!%p1007_p11)
}
 0x31c   :  { %690 = dma.vmem_to_hbm [thread:$0]  %s685_s9, 256, %s1167_s7, [#allocation4], %s1020_s11, %s1020_s11, %s1021_s12  }
 0x31d   :  { %1017 = dma.done.wait [#allocation4], 256  }
 0x31e   :  { %1018 = vsyncadd [#allocation4], 4294967040 }
 0x31f   :  { %694 = vsyncpa [#allocation3], 1 }
 0x320   :  { %695 = vsyncpa [#allocation6], 1 }
 0x321   :  { %696 = vsyncpa [#allocation9], 1 }
 0x322   :  { %697 = vsyncpa [#allocation4], 1 }

</bundles_post_ra>
